<compile_context>
chip_gen: v5e
topology: v5e:2x2
jax: 0.10.0
libtpu: 0.0.40
codegen_flags: <defaults>
</compile_context>

<pallas_src>
import functools

import jax
import jax.numpy as jnp
from jax.experimental import pallas as pl
from jax.experimental.pallas import tpu as pltpu

NEG_SLOPE = 0.01  # PyTorch LeakyReLU default negative_slope


def _round_up(x, m):
    return ((x + m - 1) // m) * m


def _fused_linear_kernel(x_ref, w_ref, b_ref, *rest, activation, has_mask):
    """One (bm, N) output tile: act(x_tile @ W + b) [* mask_tile]."""
    if has_mask:
        mask_ref, o_ref = rest
    else:
        (o_ref,) = rest

    y = jnp.dot(x_ref[...], w_ref[...], preferred_element_type=jnp.float32)
    y = y + b_ref[...]                       # (1, N) bias broadcast over rows

    if activation == "leaky_relu":
        y = jnp.where(y >= 0, y, NEG_SLOPE * y)
    elif activation == "softmax":            # stable softmax over last axis
        y = y - jnp.max(y, axis=-1, keepdims=True)
        e = jnp.exp(y)
        y = e / jnp.sum(e, axis=-1, keepdims=True)
    # activation is None -> plain linear.

    if has_mask:                             # fused inverted dropout
        y = y * mask_ref[...]

    o_ref[...] = y.astype(o_ref.dtype)


def fused_linear(x, w, b, *, activation="leaky_relu", dropout_p=0.0,
                 training=False, rng=None, bm=256, compute_dtype=None):
    """dropout(act(x @ w + b)) as a single pallas_call.

    x: (M, K) f32, w: (K, N) f32 (transpose of torch Linear.weight), b: (N,).
    """
    M, K = x.shape
    Kw, N = w.shape
    assert Kw == K and b.shape == (N,)

    if compute_dtype is not None:            # e.g. jnp.bfloat16 on v6e/v7x
        x = x.astype(compute_dtype)
        w = w.astype(compute_dtype)

    # Pad tiny K (4, 5, ...) to the sublane quantum; zero rows keep y exact.
    if K % 8 != 0:
        kp = _round_up(K, 8)
        x = jnp.pad(x, ((0, 0), (0, kp - K)))
        w = jnp.pad(w, ((0, kp - K), (0, 0)))
        K = kp

    bm = min(bm, _round_up(M, 8))
    grid = (pl.cdiv(M, bm),)                 # rows only; K fully resident

    use_mask = bool(training) and float(dropout_p) > 0.0
    inputs = [x, w, b.reshape(1, N).astype(jnp.float32)]
    in_specs = [
        pl.BlockSpec((bm, K), lambda i: (i, 0)),   # x: full-K row tile
        pl.BlockSpec((K, N), lambda i: (0, 0)),    # w: whole weight, resident
        pl.BlockSpec((1, N), lambda i: (0, 0)),    # bias row
    ]
    if use_mask:
        if rng is None:
            raise ValueError("training-mode dropout requires an rng key")
        # TODO(synk): matches nn.Dropout in distribution, not torch's RNG
        # stream bit-for-bit.
        keep = jax.random.bernoulli(rng, 1.0 - float(dropout_p), (M, N))
        mask = keep.astype(jnp.float32) / jnp.float32(1.0 - float(dropout_p))
        inputs.append(mask)
        in_specs.append(pl.BlockSpec((bm, N), lambda i: (i, 0)))

    kernel = functools.partial(_fused_linear_kernel,
                               activation=activation, has_mask=use_mask)

    return pl.pallas_call(
        kernel,
        out_shape=jax.ShapeDtypeStruct((M, N), jnp.float32),
        grid=grid,
        in_specs=in_specs,
        out_specs=pl.BlockSpec((bm, N), lambda i: (i, 0)),
        compiler_params=pltpu.CompilerParams(
            dimension_semantics=("parallel",)),
    )(*inputs)


# ----------------------------- module wrappers -----------------------------

def property_vector(params, user_tensor, *, n_cat_prop=4, n_num_prop=5,
                    dropout_p=0.3, training=False, rng=None):
    cat_prop = user_tensor[:, :n_cat_prop]
    num_prop = user_tensor[:, n_cat_prop:n_cat_prop + n_num_prop]
    des = user_tensor[:, n_cat_prop + n_num_prop:]

    if training and rng is not None:
        r_cat, r_num, r_des, r_out = jax.random.split(rng, 4)
    else:
        r_cat = r_num = r_des = r_out = None

    kw = dict(dropout_p=dropout_p, training=training)
    cat_vec = fused_linear(cat_prop, params["cat_w"], params["cat_b"],
                           rng=r_cat, **kw)
    num_vec = fused_linear(num_prop, params["num_w"], params["num_b"],
                           rng=r_num, **kw)
    des_vec = fused_linear(des, params["des_w"], params["des_b"],
                           rng=r_des, **kw)
    prop = jnp.concatenate([cat_vec, num_vec, des_vec], axis=1)
    # NOTE: torch's PropertyVector.forward never uses self.prop_module, so it
    # is intentionally omitted here as well.
    return fused_linear(prop, params["out_w"], params["out_b"],
                        rng=r_out, **kw)


def tweet_vector(params, tweet_tensor, *, dropout_p=0.3, training=False,
                 rng=None):
    return fused_linear(tweet_tensor, params["w"], params["b"],
                        dropout_p=dropout_p, training=training, rng=rng)


def hgt_detector(params, x_dict, edge_index_dict, *, dropout_p=0.3,
                 training=False, rng=None):
    if training and rng is not None:
        r_user, r_tweet, r_cls = jax.random.split(rng, 3)
    else:
        r_user = r_tweet = r_cls = None

    user_vec = property_vector(params["user"], x_dict["user"],
                               dropout_p=dropout_p, training=training,
                               rng=r_user)
    tweet_vec = tweet_vector(params["tweet"], x_dict["tweet"],
                             dropout_p=dropout_p, training=training,
                             rng=r_tweet)
    # TODO(synk): HGT_layer1/HGT_layer2 (torch_geometric HGTConv heterogeneous
    # attention message passing over edge_index_dict) have no clean Pallas
    # equivalent here; they are skipped, so tweet_vec / edge_index_dict are
    # unused and user embeddings feed the classify head directly.
    del tweet_vec, edge_index_dict

    h = fused_linear(user_vec, params["cls_w1"], params["cls_b1"],
                     activation="leaky_relu")
    out = fused_linear(h, params["cls_w2"], params["cls_b2"],
                       activation="softmax",
                       dropout_p=dropout_p, training=training, rng=r_cls)
    return out


# ------------------------- pure-JAX eval reference -------------------------

def _ref_lin_leaky(x, w, b):
    y = x @ w + b
    return jnp.where(y >= 0, y, NEG_SLOPE * y)


def hgt_detector_ref(params, x_dict):
    """Eval mode (dropout = identity); HGT layers skipped as in hgt_detector."""
    u = x_dict["user"]
    p = params["user"]
    cat = _ref_lin_leaky(u[:, :4], p["cat_w"], p["cat_b"])
    num = _ref_lin_leaky(u[:, 4:9], p["num_w"], p["num_b"])
    des = _ref_lin_leaky(u[:, 9:], p["des_w"], p["des_b"])
    prop = _ref_lin_leaky(jnp.concatenate([cat, num, des], axis=1),
                          p["out_w"], p["out_b"])
    h = _ref_lin_leaky(prop, params["cls_w1"], params["cls_b1"])
    logits = h @ params["cls_w2"] + params["cls_b2"]
    return jax.nn.softmax(logits, axis=1)


if __name__ == "__main__":
    n_cat, n_num, des_size, tweet_size, emb = 4, 5, 768, 768, 128
    n_user, n_tweet = 16, 8

    key = jax.random.PRNGKey(0)
    keys = jax.random.split(key, 16)

    def init(k, shape):       # (in, out) layout = transpose of torch weight
        return jax.random.normal(k, shape, dtype=jnp.float32) * 0.02

    params = {
        "user": {
            "cat_w": init(keys[0], (n_cat, emb // 4)),
            "cat_b": init(keys[1], (emb // 4,)),
            "num_w": init(keys[2], (n_num, emb // 4)),
            "num_b": init(keys[3], (emb // 4,)),
            "des_w": init(keys[4], (des_size, emb // 2)),
            "des_b": init(keys[5], (emb // 2,)),
            "out_w": init(keys[6], (emb, emb)),
            "out_b": init(keys[7], (emb,)),
        },
        "tweet": {
            "w": init(keys[8], (tweet_size, emb)),
            "b": init(keys[9], (emb,)),
        },
        "cls_w1": init(keys[10], (emb, emb)),
        "cls_b1": init(keys[11], (emb,)),
        "cls_w2": init(keys[12], (emb, 2)),
        "cls_b2": init(keys[13], (2,)),
    }

    x_dict = {
        "user": jax.random.normal(keys[14], (n_user, n_cat + n_num + des_size),
                                  dtype=jnp.float32),
        "tweet": jax.random.normal(keys[15], (n_tweet, tweet_size),
                                   dtype=jnp.float32),
    }
    edge_index_dict = {   # only consumed by the (skipped) HGT layers
        ("user", "follow", "user"): jnp.zeros((2, 4), dtype=jnp.int32),
        ("user", "friend", "user"): jnp.zeros((2, 4), dtype=jnp.int32),
        ("user", "post", "tweet"): jnp.zeros((2, 4), dtype=jnp.int32),
        ("tweet", "rev_post", "user"): jnp.zeros((2, 4), dtype=jnp.int32),
    }

    # Eval-mode forward, checked against the pure-JAX reference.
    out = hgt_detector(params, x_dict, edge_index_dict,
                       dropout_p=0.3, training=False)
    out = jax.block_until_ready(out)
    ref = hgt_detector_ref(params, x_dict)
    assert out.shape == (n_user, 2)
    assert jnp.allclose(out, ref, atol=1e-4, rtol=1e-4), \
        float(jnp.max(jnp.abs(out - ref)))
    assert jnp.allclose(jnp.sum(out, axis=1), 1.0, atol=1e-5)

    # Training-mode smoke test (dropout masks drawn with jax.random).
    out_train = jax.block_until_ready(
        hgt_detector(params, x_dict, edge_index_dict,
                     dropout_p=0.3, training=True, rng=jax.random.PRNGKey(7)))
    assert out_train.shape == (n_user, 2)

    print("KERNEL_OK")
</pallas_src>

<mosaic_0001>
module attributes {stable_mosaic.version = 11 : i64} {
  func.func @_fused_linear_kernel(%arg0: i32, %arg1: memref<16x8xf32, #tpu.memory_space<vmem>>, %arg2: memref<8x32xf32, #tpu.memory_space<vmem>>, %arg3: memref<1x32xf32, #tpu.memory_space<vmem>>, %arg4: memref<16x32xf32, #tpu.memory_space<vmem>>) attributes {dimension_semantics = [#tpu.dimension_semantics<parallel>], iteration_bounds = array<i64: 1>, scalar_prefetch = 0 : i64, scratch_operands = 0 : i64, tpu.core_type = #tpu.core_type<tc>, window_params = [{transform_indices = @transform_0, window_bounds = array<i64: 16, 8>}, {pipeline_mode = #tpu.pipeline_mode<synchronous>, transform_indices = @transform_1, window_bounds = array<i64: 8, 32>}, {pipeline_mode = #tpu.pipeline_mode<synchronous>, transform_indices = @transform_2, window_bounds = array<i64: 1, 32>}, {transform_indices = @transform_3, window_bounds = array<i64: 16, 32>}]} {
    %c0 = arith.constant 0 : index
    %c0_0 = arith.constant 0 : index
    %0 = vector.load %arg1[%c0, %c0_0] : memref<16x8xf32, #tpu.memory_space<vmem>>, vector<16x8xf32>
    %c0_1 = arith.constant 0 : index
    %c0_2 = arith.constant 0 : index
    %1 = vector.load %arg2[%c0_1, %c0_2] : memref<8x32xf32, #tpu.memory_space<vmem>>, vector<8x32xf32>
    %cst = arith.constant dense<0.000000e+00> : vector<16x32xf32>
    %2 = tpu.matmul %0, %1, %cst {dimension_numbers = #tpu.dot_dimension_numbers<[1], [0], [0], [1], [0, 0, 1, 1], [], []>} : vector<16x8xf32>, vector<8x32xf32>, vector<16x32xf32> -> vector<16x32xf32>
    %c0_3 = arith.constant 0 : index
    %c0_4 = arith.constant 0 : index
    %3 = vector.load %arg3[%c0_3, %c0_4] : memref<1x32xf32, #tpu.memory_space<vmem>>, vector<1x32xf32>
    %4 = vector.broadcast %3 : vector<1x32xf32> to vector<16x32xf32>
    %5 = arith.addf %2, %4 : vector<16x32xf32>
    %cst_5 = arith.constant 0.000000e+00 : f32
    %6 = vector.broadcast %cst_5 : f32 to vector<16x32xf32>
    %7 = arith.cmpf oge, %5, %6 : vector<16x32xf32>
    %cst_6 = arith.constant 0.00999999977 : f32
    %8 = vector.broadcast %cst_6 : f32 to vector<16x32xf32>
    %9 = arith.mulf %8, %5 : vector<16x32xf32>
    %10 = arith.select %7, %5, %9 : vector<16x32xi1>, vector<16x32xf32>
    %c0_7 = arith.constant 0 : index
    %c0_8 = arith.constant 0 : index
    %11 = vector.load %arg4[%c0_7, %c0_8] : memref<16x32xf32, #tpu.memory_space<vmem>>, vector<16x32xf32>
    tpu.vector_store %arg4[%c0_7, %c0_8], %10 {strides = array<i32>} : memref<16x32xf32, #tpu.memory_space<vmem>>, vector<16x32xf32>,
    return
  }
  func.func @transform_0(%arg0: i32) -> (i32, i32) {
    %c0_i32 = arith.constant 0 : i32
    %c0_i32_0 = arith.constant 0 : i32
    return %arg0, %c0_i32 : i32, i32
  }
  func.func @transform_1(%arg0: i32) -> (i32, i32) {
    %c0_i32 = arith.constant 0 : i32
    %c0_i32_0 = arith.constant 0 : i32
    %c0_i32_1 = arith.constant 0 : i32
    return %c0_i32, %c0_i32_0 : i32, i32
  }
  func.func @transform_2(%arg0: i32) -> (i32, i32) {
    %c0_i32 = arith.constant 0 : i32
    %c0_i32_0 = arith.constant 0 : i32
    %c0_i32_1 = arith.constant 0 : i32
    return %c0_i32, %c0_i32_0 : i32, i32
  }
  func.func @transform_3(%arg0: i32) -> (i32, i32) {
    %c0_i32 = arith.constant 0 : i32
    %c0_i32_0 = arith.constant 0 : i32
    return %arg0, %c0_i32 : i32, i32
  }
}

</mosaic_0001>

<bundles_post_ra>
// kernel: tpu_custom_call.1
= control target key start
LH: loop header
LB: loop body
LE: loop exit
PB: predicated region body
PF: predicated region fallthrough
CT: control target
= control target key end

     0   :  { %vm22_vm0 = vcmask 64512   ;;  %s150_s0 = inlined_call_operand.vmem [shape: f32[16,8], index: 0, kind: input, shape index: {}]   ;;  %s151_s1 = inlined_call_operand.vmem [shape: f32[8,32], index: 1, kind: input, shape index: {}]   ;;  %s152_s2 = inlined_call_operand.vmem [shape: f32[1,32], index: 2, kind: input, shape index: {}]   ;;  %s153_s3 = inlined_call_operand.hbm [shape: f32[16,32], index: 3, kind: output, shape index: {}]  }
   0x1   :  { %v17_v0 = vld [vmem:[%s151_s1] sm:$0xff]  ;;  %v16_v2 = vld [vmem:[%s150_s0 + $0x8] sm:$0xff] }
   0x2   :  { %v15_v1 = vld [vmem:[%s150_s0] sm:$0xff]  ;;  %44 = vmatpush.msra.mxu0 %v17_v0  ;;  %81 = vmatpush.msra.mxu1 %v17_v0 }
   0x3   :  { %8 = vsyncpa [#allocation3], 0  ;;  %79 = vmatmul.msk.f32.vlgmr.msra.gmra.mxu0 %vm22_vm0, %v15_v1  ;;  %80 = vmatmul.msk.f32.vlgmr.msra.gmra.mxu1 %vm22_vm0, %v16_v2  ;;  %v85_v3 = vld [vmem:[%s152_s2] ss:$0 sm:$0xff]  ;;  %s112_s1 = smov [#allocation2]   ;;  %s67_s23 = sshll.u32 %s153_s3, 4  ;;  %s68_s23 = int_to_ptr.hbm [resolvable:$true] %s67_s23 }
   0x4   :  { %s65_s20 = sshll.u32 %s112_s1, 4  ;;  %vm58_vm1 = vcmask 261120   ;;  %s113_s0 = smov 128   ;;  %s66_s20 = int_to_ptr.vmem [resolvable:$true] %s65_s20 }
   0x5   :  { %s114_s2 = smov 8  }
  0x80   :  { %v46_v4 = vpop.f32.mrf.mxu0  ;;  %v49_v5 = vpop.f32.mrf.mxu1 }
  0x81   :  { %v47_v6 = vadd.f32 %v85_v3, %v46_v4  ;;  %v50_v7 = vadd.f32 %v85_v3, %v49_v5 }
  0x83   :  { %vm52_vm2 = vcmp.ge.f32.partialorder %v47_v6, 0.0  ;;  %v54_v8 = vmul.f32 0.01, %v47_v6  ;;  %vm53_vm3 = vcmp.ge.f32.partialorder %v50_v7, 0.0  ;;  %v55_v9 = vmul.f32 0.01, %v50_v7 }
  0x85   :  { %v56_v10 = vsel %vm52_vm2, %v47_v6, %v54_v8  ;;  %v57_v11 = vsel %vm53_vm3, %v50_v7, %v55_v9 }
  0x86   :  { %59 = vst.msk [vmem:[#allocation2] sm:$0xff] %vm58_vm1, %v56_v10 }
  0x87   :  { %60 = vst.msk [vmem:[#allocation2 + $0x8] sm:$0xff] %vm58_vm1, %v57_v11 }
  0x88   :  { %73 = dma.vmem_to_hbm [thread:$0]  %s66_s20, 256, %s68_s23, [#allocation3], %s113_s0, %s113_s0, %s114_s2  }
  0x89   :  { %110 = dma.done.wait [#allocation3], 256  }
  0x8a   :  { %111 = vsyncadd [#allocation3], 4294967040 }
  0x8b   :  { %78 = vsyncpa [#allocation3], 1 }

</bundles_post_ra>
